<compile_context>
chip_gen: v5e
topology: v5e:2x2
jax: 0.10.0
libtpu: 0.0.40
codegen_flags: <defaults>
</compile_context>

<pallas_src>
import functools

import jax
import jax.numpy as jnp
from jax.experimental import pallas as pl
from jax.experimental.pallas import tpu as pltpu

HIDDEN = 100        # nn.Linear(input_size, 100)
HIDDEN_PAD = 128    # lane-aligned hidden width fed to the kernel


def _label_classifier_kernel(x_ref, w1_ref, b1_ref, w2_ref, b2_ref, o_ref):
    # x_ref:  (tb, in)   f32       w1_ref: (in, 128)  bf16   b1_ref: (1, 128) f32
    # w2_ref: (128, out) bf16      b2_ref: (1, out)   f32    o_ref:  (tb, out) f32
    # Cast x to bf16 in-kernel (free VPU work, halves effective x HBM traffic vs a
    # separate wrapper-side cast pass).
    x_bf = x_ref[...].astype(jnp.bfloat16)

    # Linear(input_size, 100) + ReLU  (hidden zero-padded to 128 lanes; pad cols have
    # zero weight and zero bias, so ReLU keeps them at exactly 0).
    h = jnp.dot(x_bf, w1_ref[...], preferred_element_type=jnp.float32)
    h = jnp.maximum(h + b1_ref[...], 0.0).astype(jnp.bfloat16)

    # Linear(100, output_size) — padded w2 rows are zero, so they contribute nothing.
    logits = jnp.dot(h, w2_ref[...], preferred_element_type=jnp.float32) + b2_ref[...]

    # Softmax(dim=1) — numerically stable; reciprocal goes to the EUP slot.
    m = jnp.max(logits, axis=1, keepdims=True)
    e = jnp.exp(logits - m)
    denom = jnp.sum(e, axis=1, keepdims=True)
    o_ref[...] = (e * pl.reciprocal(denom, approx=True)).astype(o_ref.dtype)


def _pick_batch_tile(B, input_size, hp, output_size, *, max_tile=8192,
                     vmem_budget_bytes=16 * 1024 * 1024):
    """VMEM-budgeted batch tile.  Returns (tb, grid_b, padded_B)."""
    # Per-row VMEM estimate: double-buffered f32 x block, in-kernel bf16 x copy,
    # f32+bf16 hidden, softmax temporaries, double-buffered f32 output block.
    per_row = (2 * input_size * 4        # x f32, double-buffered
               + input_size * 2          # x bf16 copy
               + hp * (4 + 2)            # hidden f32 + bf16
               + output_size * 4 * 4     # logits / exp / softmax temporaries
               + 2 * output_size * 4)    # output f32, double-buffered
    cap = max(16, min(max_tile, vmem_budget_bytes // per_row))
    cap = (cap // 16) * 16               # bf16-friendly sublane packing (16 rows)
    if B <= cap:
        # Single grid step, tile == full batch dim -> no (8,128) constraint, no pad,
        # no extra per-step overhead on single-TC v5e/v6e.
        return B, 1, B
    # Multi-tile: prefer a tile that divides B exactly to skip the jnp.pad HBM copy.
    tb = cap
    for cand in range(cap, max(cap // 2, 16) - 1, -16):
        if B % cand == 0:
            tb = cand
            break
    grid_b = -(-B // tb)
    return tb, grid_b, grid_b * tb


def prepare_params(w1, b1, w2, b2):
    """One-time prep (hoisted out of the hot path): pad hidden to 128, cast dtypes."""
    hidden = w1.shape[1]
    hp = max(HIDDEN_PAD, ((hidden + 127) // 128) * 128)
    if hp != hidden:
        w1 = jnp.pad(w1, ((0, 0), (0, hp - hidden)))
        b1 = jnp.pad(b1, ((0, 0), (0, hp - hidden)))
        w2 = jnp.pad(w2, ((0, hp - hidden), (0, 0)))
    return (w1.astype(jnp.bfloat16), b1.astype(jnp.float32),
            w2.astype(jnp.bfloat16), b2.astype(jnp.float32))


@functools.partial(jax.jit, static_argnames=("max_tile",))
def label_classifier_forward(x, w1p, b1p, w2p, b2p, *, max_tile=8192):
    """x: [B, input_size] f32 -> softmax probabilities [B, output_size] f32.

    w1p/b1p/w2p/b2p must come from prepare_params (padded + cast once)."""
    B, input_size = x.shape
    hp = w1p.shape[1]
    output_size = w2p.shape[1]

    tb, grid_b, Bp = _pick_batch_tile(B, input_size, hp, output_size, max_tile=max_tile)
    if Bp != B:
        x = jnp.pad(x, ((0, Bp - B), (0, 0)))  # rare: only when B exceeds the VMEM cap
                                               # and no even divisor tile exists

    # TODO(synk): on v7x, switch dimension_semantics to (pltpu.CORE_PARALLEL,) with an
    # even grid_b to actually shard the batch axis across the 2 TensorCores.
    out = pl.pallas_call(
        _label_classifier_kernel,
        out_shape=jax.ShapeDtypeStruct((Bp, output_size), jnp.float32),
        grid_spec=pltpu.PrefetchScalarGridSpec(
            num_scalar_prefetch=0,
            grid=(grid_b,),
            in_specs=[
                pl.BlockSpec((tb, input_size), lambda i: (i, 0)),
                pl.BlockSpec((input_size, hp), lambda i: (0, 0)),
                pl.BlockSpec((1, hp), lambda i: (0, 0)),
                pl.BlockSpec((hp, output_size), lambda i: (0, 0)),
                pl.BlockSpec((1, output_size), lambda i: (0, 0)),
            ],
            out_specs=pl.BlockSpec((tb, output_size), lambda i: (i, 0)),
        ),
        compiler_params=pltpu.CompilerParams(
            dimension_semantics=("arbitrary",),
            vmem_limit_bytes=32 * 1024 * 1024,  # fits v7x (64 MiB phys) and raises v5e's 16 MiB default
        ),
    )(x, w1p, b1p, w2p, b2p)
    return out[:B]


def xavier_normal(key, fan_out, fan_in, dtype=jnp.float32):
    # PyTorch nn.init.xavier_normal_ on a [out, in] weight: std = sqrt(2/(fan_in+fan_out))
    std = (2.0 / (fan_in + fan_out)) ** 0.5
    return std * jax.random.normal(key, (fan_out, fan_in), dtype=dtype)


def init_params(key, input_size, output_size):
    k1, k2, k3, k4 = jax.random.split(key, 4)
    # Linear 1: weight [100, input_size], bias [100] (PyTorch default uniform bias)
    w1_pt = xavier_normal(k1, HIDDEN, input_size)
    bound1 = 1.0 / (input_size ** 0.5)
    b1 = jax.random.uniform(k2, (HIDDEN,), minval=-bound1, maxval=bound1)
    # Linear 2: weight [output_size, 100], bias [output_size]
    w2_pt = xavier_normal(k3, output_size, HIDDEN)
    bound2 = 1.0 / (HIDDEN ** 0.5)
    b2 = jax.random.uniform(k4, (output_size,), minval=-bound2, maxval=bound2)
    # Transpose to [in, out] for the kernel; biases kept 2D [1, out] for TPU layout.
    return (w1_pt.T, b1.reshape(1, HIDDEN), w2_pt.T, b2.reshape(1, output_size))


def reference_forward_f32(x, w1, b1, w2, b2):
    h = jnp.maximum(x @ w1 + b1, 0.0)
    logits = h @ w2 + b2
    return jax.nn.softmax(logits, axis=1)


def reference_forward_bf16(x, w1, b1, w2, b2):
    # Mirrors the kernel's quantization (bf16 operands, f32 accumulation).
    f32 = jnp.float32
    xb = x.astype(jnp.bfloat16).astype(f32)
    w1b = w1.astype(jnp.bfloat16).astype(f32)
    w2b = w2.astype(jnp.bfloat16).astype(f32)
    h = jnp.maximum(xb @ w1b + b1, 0.0).astype(jnp.bfloat16).astype(f32)
    logits = h @ w2b + b2
    return jax.nn.softmax(logits, axis=1)


if __name__ == "__main__":
    input_size = 32
    output_size = 6

    key = jax.random.PRNGKey(0)
    kx, kp, kx2 = jax.random.split(key, 3)
    w1, b1, w2, b2 = init_params(kp, input_size, output_size)
    w1p, b1p, w2p, b2p = prepare_params(w1, b1, w2, b2)   # done once, off the hot path

    # --- Small demo batch (single grid step, no padding) ---
    batch = 8
    x = jax.random.normal(kx, (batch, input_size), dtype=jnp.float32)
    out = jax.block_until_ready(label_classifier_forward(x, w1p, b1p, w2p, b2p))

    ref_bf16 = reference_forward_bf16(x, w1, b1, w2, b2)
    ref_f32 = reference_forward_f32(x, w1, b1, w2, b2)
    assert out.shape == (batch, output_size)
    assert jnp.allclose(out, ref_bf16, atol=1e-2, rtol=1e-2), "mismatch vs bf16-aware reference"
    assert jnp.allclose(out, ref_f32, atol=4e-2, rtol=4e-2), "mismatch vs f32 reference"
    assert jnp.allclose(jnp.sum(out, axis=1), 1.0, atol=1e-2)

    # --- Uneven larger batch: fits the VMEM cap -> ONE grid step, no pad copy ---
    batch2 = 300
    x2 = jax.random.normal(kx2, (batch2, input_size), dtype=jnp.float32)
    out2 = jax.block_until_ready(label_classifier_forward(x2, w1p, b1p, w2p, b2p))
    ref2 = reference_forward_bf16(x2, w1, b1, w2, b2)
    assert out2.shape == (batch2, output_size)
    assert jnp.allclose(out2, ref2, atol=1e-2, rtol=1e-2), "mismatch on single-tile ragged batch"
    assert jnp.allclose(jnp.sum(out2, axis=1), 1.0, atol=1e-2)

    # --- Force the multi-tile + padded-batch path (small cap) to exercise the grid ---
    out3 = jax.block_until_ready(
        label_classifier_forward(x2, w1p, b1p, w2p, b2p, max_tile=128))
    assert out3.shape == (batch2, output_size)
    assert jnp.allclose(out3, ref2, atol=1e-2, rtol=1e-2), "mismatch on multi-tile padded batch"
    assert jnp.allclose(jnp.sum(out3, axis=1), 1.0, atol=1e-2)

    print("KERNEL_OK")
</pallas_src>

<mosaic_0001>
module attributes {stable_mosaic.version = 11 : i64} {
  func.func @_label_classifier_kernel(%arg0: i32, %arg1: memref<8x32xf32, #tpu.memory_space<vmem>>, %arg2: memref<32x128xbf16, #tpu.memory_space<vmem>>, %arg3: memref<1x128xf32, #tpu.memory_space<vmem>>, %arg4: memref<128x6xbf16, #tpu.memory_space<vmem>>, %arg5: memref<1x6xf32, #tpu.memory_space<vmem>>, %arg6: memref<8x6xf32, #tpu.memory_space<vmem>>) attributes {dimension_semantics = [#tpu.dimension_semantics<arbitrary>], iteration_bounds = array<i64: 1>, scalar_prefetch = 0 : i64, scratch_operands = 0 : i64, tpu.core_type = #tpu.core_type<tc>, window_params = [{transform_indices = @transform_0, window_bounds = array<i64: 8, 32>}, {pipeline_mode = #tpu.pipeline_mode<synchronous>, transform_indices = @transform_1, window_bounds = array<i64: 32, 128>}, {pipeline_mode = #tpu.pipeline_mode<synchronous>, transform_indices = @transform_2, window_bounds = array<i64: 1, 128>}, {pipeline_mode = #tpu.pipeline_mode<synchronous>, transform_indices = @transform_3, window_bounds = array<i64: 128, 6>}, {pipeline_mode = #tpu.pipeline_mode<synchronous>, transform_indices = @transform_4, window_bounds = array<i64: 1, 6>}, {transform_indices = @transform_5, window_bounds = array<i64: 8, 6>}]} {
    %c0 = arith.constant 0 : index
    %c0_0 = arith.constant 0 : index
    %0 = vector.load %arg1[%c0, %c0_0] : memref<8x32xf32, #tpu.memory_space<vmem>>, vector<8x32xf32>
    %1 = arith.truncf %0 : vector<8x32xf32> to vector<8x32xbf16>
    %c0_1 = arith.constant 0 : index
    %c0_2 = arith.constant 0 : index
    %2 = vector.load %arg2[%c0_1, %c0_2] : memref<32x128xbf16, #tpu.memory_space<vmem>>, vector<32x128xbf16>
    %cst = arith.constant dense<0.000000e+00> : vector<8x128xf32>
    %3 = tpu.matmul %1, %2, %cst {dimension_numbers = #tpu.dot_dimension_numbers<[1], [0], [0], [1], [0, 0, 1, 1], [], []>} : vector<8x32xbf16>, vector<32x128xbf16>, vector<8x128xf32> -> vector<8x128xf32>
    %c0_3 = arith.constant 0 : index
    %c0_4 = arith.constant 0 : index
    %4 = vector.load %arg3[%c0_3, %c0_4] : memref<1x128xf32, #tpu.memory_space<vmem>>, vector<1x128xf32>
    %5 = vector.broadcast %4 : vector<1x128xf32> to vector<8x128xf32>
    %6 = arith.addf %3, %5 : vector<8x128xf32>
    %cst_5 = arith.constant 0.000000e+00 : f32
    %7 = vector.broadcast %cst_5 : f32 to vector<8x128xf32>
    %8 = arith.maximumf %6, %7 : vector<8x128xf32>
    %9 = arith.truncf %8 : vector<8x128xf32> to vector<8x128xbf16>
    %c0_6 = arith.constant 0 : index
    %c0_7 = arith.constant 0 : index
    %10 = vector.load %arg4[%c0_6, %c0_7] : memref<128x6xbf16, #tpu.memory_space<vmem>>, vector<128x6xbf16>
    %cst_8 = arith.constant dense<0.000000e+00> : vector<8x6xf32>
    %11 = tpu.matmul %9, %10, %cst_8 {dimension_numbers = #tpu.dot_dimension_numbers<[1], [0], [0], [1], [0, 0, 1, 1], [], []>} : vector<8x128xbf16>, vector<128x6xbf16>, vector<8x6xf32> -> vector<8x6xf32>
    %c0_9 = arith.constant 0 : index
    %c0_10 = arith.constant 0 : index
    %12 = vector.load %arg5[%c0_9, %c0_10] : memref<1x6xf32, #tpu.memory_space<vmem>>, vector<1x6xf32>
    %13 = vector.broadcast %12 : vector<1x6xf32> to vector<8x6xf32>
    %14 = arith.addf %11, %13 : vector<8x6xf32>
    %cst_11 = arith.constant dense<0xFF800000> : vector<8xf32>
    %15 = vector.multi_reduction <maximumf>, %14, %cst_11 [1] : vector<8x6xf32> to vector<8xf32>
    %16 = vector.shape_cast %15 : vector<8xf32> to vector<8x1xf32>
    %17 = vector.broadcast %16 : vector<8x1xf32> to vector<8x6xf32>
    %18 = arith.subf %14, %17 : vector<8x6xf32>
    %19 = math.exp %18 : vector<8x6xf32>
    %cst_12 = arith.constant dense<0.000000e+00> : vector<8xf32>
    %20 = vector.multi_reduction <add>, %19, %cst_12 [1] : vector<8x6xf32> to vector<8xf32>
    %21 = vector.shape_cast %20 : vector<8xf32> to vector<8x1xf32>
    %22 = tpu.reciprocal %21 {approx = true} : vector<8x1xf32> -> vector<8x1xf32>
    %23 = vector.broadcast %22 : vector<8x1xf32> to vector<8x6xf32>
    %24 = arith.mulf %19, %23 : vector<8x6xf32>
    %c0_13 = arith.constant 0 : index
    %c0_14 = arith.constant 0 : index
    %25 = vector.load %arg6[%c0_13, %c0_14] : memref<8x6xf32, #tpu.memory_space<vmem>>, vector<8x6xf32>
    tpu.vector_store %arg6[%c0_13, %c0_14], %24 {strides = array<i32>} : memref<8x6xf32, #tpu.memory_space<vmem>>, vector<8x6xf32>,
    return
  }
  func.func @transform_0(%arg0: i32) -> (i32, i32) {
    %c0_i32 = arith.constant 0 : i32
    %c0_i32_0 = arith.constant 0 : i32
    return %arg0, %c0_i32 : i32, i32
  }
  func.func @transform_1(%arg0: i32) -> (i32, i32) {
    %c0_i32 = arith.constant 0 : i32
    %c0_i32_0 = arith.constant 0 : i32
    %c0_i32_1 = arith.constant 0 : i32
    return %c0_i32, %c0_i32_0 : i32, i32
  }
  func.func @transform_2(%arg0: i32) -> (i32, i32) {
    %c0_i32 = arith.constant 0 : i32
    %c0_i32_0 = arith.constant 0 : i32
    %c0_i32_1 = arith.constant 0 : i32
    return %c0_i32, %c0_i32_0 : i32, i32
  }
  func.func @transform_3(%arg0: i32) -> (i32, i32) {
    %c0_i32 = arith.constant 0 : i32
    %c0_i32_0 = arith.constant 0 : i32
    %c0_i32_1 = arith.constant 0 : i32
    return %c0_i32, %c0_i32_0 : i32, i32
  }
  func.func @transform_4(%arg0: i32) -> (i32, i32) {
    %c0_i32 = arith.constant 0 : i32
    %c0_i32_0 = arith.constant 0 : i32
    %c0_i32_1 = arith.constant 0 : i32
    return %c0_i32, %c0_i32_0 : i32, i32
  }
  func.func @transform_5(%arg0: i32) -> (i32, i32) {
    %c0_i32 = arith.constant 0 : i32
    %c0_i32_0 = arith.constant 0 : i32
    return %arg0, %c0_i32 : i32, i32
  }
}

</mosaic_0001>

<bundles_post_ra>
// kernel: label_classifier_forward.1
= control target key start
LH: loop header
LB: loop body
LE: loop exit
PB: predicated region body
PF: predicated region fallthrough
CT: control target
= control target key end

     0   :  { %s333_s0 = inlined_call_operand.vmem [shape: f32[8,32], index: 0, kind: input, shape index: {}]   ;;  %s334_s1 = inlined_call_operand.vmem [shape: bf16[32,128], index: 1, kind: input, shape index: {}]   ;;  %s335_s2 = inlined_call_operand.vmem [shape: f32[1,128], index: 2, kind: input, shape index: {}]   ;;  %s336_s3 = inlined_call_operand.vmem [shape: bf16[128,6], index: 3, kind: input, shape index: {}]   ;;  %s337_s4 = inlined_call_operand.vmem [shape: f32[1,6], index: 4, kind: input, shape index: {}]   ;;  %s338_s5 = inlined_call_operand.hbm [shape: f32[8,6], index: 5, kind: output, shape index: {}]  }
   0x1   :  { %v215_v0 = vld [vmem:[%s334_s1 + $0x8] sm:$0xff]  ;;  %v223_v1 = vld [vmem:[%s336_s3 + $0x38] sm:$0xff]  ;;  %v214_v2 = vld [vmem:[%s334_s1] sm:$0xff] }
   0x2   :  { %54 = vmatpush.bf16.msra.mxu0 %v215_v0  ;;  %v22_v3 = vld [vmem:[%s333_s0] sm:$0xff]  ;;  %131 = vmatpush.bf16.msra.mxu1 %v223_v1  ;;  %v222_v4 = vld [vmem:[%s336_s3 + $0x30] sm:$0xff] }
   0x3   :  { %10 = vsyncpa [#allocation3], 0  ;;  %v23_v5 = vpack.c.bf16 %v22_v3, %v22_v3  ;;  %vm44_vm0 = vcmask 261120   ;;  %v221_v6 = vld [vmem:[%s336_s3 + $0x28] sm:$0xff]  ;;  %v220_v7 = vld [vmem:[%s336_s3 + $0x20] sm:$0xff]  ;;  %vm144_vm1 = vcmask 48128  }
   0x4   :  { %v219_v8 = vld [vmem:[%s336_s3 + $0x18] sm:$0xff]  ;;  %v218_v9 = vld [vmem:[%s336_s3 + $0x10] sm:$0xff]  ;;  %v217_v10 = vld [vmem:[%s336_s3 + $0x8] sm:$0xff]  ;;  %s164_s18 = sshll.u32 %s338_s5, 4  ;;  %s165_s18 = int_to_ptr.hbm [resolvable:$true] %s164_s18 }
   0x5   :  { %v216_v11 = vld [vmem:[%s336_s3] sm:$0xff] }
   0x6   :  { %55 = vmatpush.bf16.msra.mxu0 %v214_v2  ;;  %132 = vmatpush.bf16.msra.mxu1 %v222_v4  ;;  %v225_v12 = vld [vmem:[%s335_s2] ss:$0 sm:$0xff]  ;;  %s257_s2 = smov [#allocation2]  }
   0x7   :  { %v226_v18 = vld [vmem:[%s337_s4] ss:$0 sm:$0xff]  ;;  %s162_s3 = sshll.u32 %s257_s2, 4  ;;  %s163_s3 = int_to_ptr.vmem [resolvable:$true] %s162_s3 }
   0x9   :  { %181 = vmatmul.msk.bf16.vlgmr.msra.gmra.mxu0 %vm44_vm0, %v23_v5 }
   0xa   :  { %133 = vmatpush.bf16.msra.mxu1 %v221_v6 }
   0xe   :  { %134 = vmatpush.bf16.msra.mxu1 %v220_v7 }
  0x12   :  { %135 = vmatpush.bf16.msra.mxu1 %v219_v8 }
  0x16   :  { %136 = vmatpush.bf16.msra.mxu1 %v218_v9 }
  0x1a   :  { %137 = vmatpush.bf16.msra.mxu1 %v217_v10 }
  0x1e   :  { %138 = vmatpush.bf16.msra.mxu1 %v216_v11 }
  0x86   :  { %v57_v13 = vpop.f32.mrf.mxu0 }
  0x87   :  { %v58_v14 = vadd.f32 %v225_v12, %v57_v13 }
  0x89   :  { %v61_v15 = vmax.f32 %v58_v14, 0.0 }
  0x8b   :  { %v62_v16 = vpack.c.bf16 %v61_v15, %v61_v15 }
  0x8d   :  { %139 = vmatmul.bf16.vlgmr.msra.gmra.mxu1 %v62_v16 }
  0x8e   :  { %v59_v17 = vpop.f32.mrf.mxu0 }
 0x10a   :  { %v140_v19 = vpop.f32.mrf.mxu1 }
 0x10b   :  { %v141_v20 = vadd.f32 %v226_v18, %v140_v19 }
 0x10d   :  { %v145_v21 = vsel %vm144_vm1, %v141_v20, -inf }
 0x10e   :  { %146 = vmax.xlane.f32.xlu0 %v145_v21 }
 0x112   :  { %v142_v22 = vpop.f32.mrf.mxu1 }
 0x181   :  { %v147_v23 = vpop.xlane.xlu0 %146 }
 0x182   :  { %v148_v24 = vsub.f32 %v141_v20, %v147_v23 }
 0x184   :  { %v149_v25 = vmul.f32 1.442695, %v148_v24 }
 0x186   :  { %227 = vpow2.f32 %v149_v25 }
 0x18c   :  { %v228_v26 = vpop.eup %227 }
 0x18d   :  { %v151_v27 = vsel %vm144_vm1, %v228_v26, 0.0 }
 0x18e   :  { %152 = vadd.xlane.f32.xlu0 %v151_v27 }
 0x201   :  { %v153_v28 = vpop.xlane.xlu0 %152 }
 0x202   :  { %229 = vrcp.f32 %v153_v28 }
 0x208   :  { %v230_v29 = vpop.eup %229 }
 0x209   :  { %v155_v30 = vmul.f32 %v230_v29, %v228_v26 }
 0x20b   :  { %156 = vst.msk [vmem:[#allocation2] sm:$0xff] %vm144_vm1, %v155_v30 }
 0x20c   :  { %167 = dma.vmem_to_hbm [thread:$0]  %s163_s3, 128, %s165_s18, [#allocation3]  }
 0x20d   :  { %255 = dma.done.wait [#allocation3], 128  }
 0x20e   :  { %256 = vsyncadd [#allocation3], 4294967168 }
 0x20f   :  { %172 = vsyncpa [#allocation3], 1 }

</bundles_post_ra>
